<compile_context>
chip_gen: v7x
topology: tpu7x:2x2x1
jax: 0.10.0
libtpu: 0.0.40
codegen_flags: <defaults>
</compile_context>

<pallas_src>
import functools

import jax
import jax.numpy as jnp
import numpy as np
from jax.experimental import pallas as pl
from jax.experimental.pallas import tpu as pltpu


def _adapt_kernel(x_ref, wdg_ref, bdg_ref, wu_ref, bu_ref, o_ref, *, bn):
    """One row tile: out = x + (silu(d) * g) @ Wu + bu, with [d|g] = x @ [Wd|Wg] + [bd|bg]."""
    x = x_ref[...]  # native dtype straight to the MXU (bf16-friendly)
    dg = jnp.dot(x, wdg_ref[...], preferred_element_type=jnp.float32)
    dg = dg + bdg_ref[...].astype(jnp.float32)
    d = dg[:, :bn]
    g = dg[:, bn:]
    z = (d * jax.nn.sigmoid(d)) * g  # SiLU gate in f32 (VPU + EUP)
    up = jnp.dot(z.astype(wu_ref.dtype), wu_ref[...],
                 preferred_element_type=jnp.float32)
    up = up + bu_ref[...].astype(jnp.float32)
    o_ref[...] = (x.astype(jnp.float32) + up).astype(o_ref.dtype)


def _pick_tm(n, e, itemsize, vmem_budget=16 * 1024 * 1024):
    """Row-tile size: double-buffered (tm, e) in + out tiles must fit the VMEM budget."""
    tm = vmem_budget // max(1, 4 * e * itemsize)   # 2 bufs (in) + 2 bufs (out)
    tm = max(128, min(2048, (tm // 128) * 128))    # MXU-friendly multiple of 128
    if n <= tm:
        return n                                    # single full-extent block
    return tm


def _adapt_rows(x_rows, wdg, bdg, wu, bu, *, tm=None):
    """Apply the gated adapter to an (N, E) row matrix, tiled over rows."""
    n, e = x_rows.shape
    bn = wu.shape[0]
    if tm is None:
        tm = _pick_tm(n, e, x_rows.dtype.itemsize)
    tm = min(tm, n)
    grid = (pl.cdiv(n, tm),)  # partial last block masked by Pallas; no jnp.pad

    itemsize = x_rows.dtype.itemsize
    weight_bytes = (wdg.size * wdg.dtype.itemsize + bdg.size * bdg.dtype.itemsize
                    + wu.size * wu.dtype.itemsize + bu.size * bu.dtype.itemsize)
    cost = pl.CostEstimate(
        flops=6 * n * e * bn,                 # 2*N*E*2BN (down/gate) + 2*N*BN*E (up)
        transcendentals=n * bn,               # sigmoid in SiLU
        bytes_accessed=2 * n * e * itemsize + weight_bytes,
    )

    return pl.pallas_call(
        functools.partial(_adapt_kernel, bn=bn),
        out_shape=jax.ShapeDtypeStruct((n, e), x_rows.dtype),
        grid_spec=pltpu.PrefetchScalarGridSpec(
            num_scalar_prefetch=0,
            grid=grid,
            in_specs=[
                pl.BlockSpec((tm, e), lambda i: (i, 0)),        # x row tile
                pl.BlockSpec((e, 2 * bn), lambda i: (0, 0)),    # [Wd | Wg]
                pl.BlockSpec((1, 2 * bn), lambda i: (0, 0)),    # [bd | bg]
                pl.BlockSpec((bn, e), lambda i: (0, 0)),        # Wu
                pl.BlockSpec((1, e), lambda i: (0, 0)),         # bu
            ],
            out_specs=pl.BlockSpec((tm, e), lambda i: (i, 0)),
        ),
        compiler_params=pltpu.CompilerParams(
            dimension_semantics=("parallel",),   # row tiles shard across TCs on v7x
        ),
        cost_estimate=cost,
    )(x_rows, wdg, bdg, wu, bu)


class FeatureAdaptLayerPallas:
    """Deterministically-initialized JAX/Pallas counterpart of FeatureAdaptLayer."""

    def __init__(self, embed_dims, bottleneck_dim, key):
        self.embed_dims = embed_dims
        self.bottleneck_dim = bottleneck_dim
        ks = jax.random.split(key, 10)

        def linear_params(kw, kb, fan_in, fan_out):
            # PyTorch nn.Linear default: U(-1/sqrt(fan_in), 1/sqrt(fan_in))
            bound = 1.0 / np.sqrt(fan_in)
            w = jax.random.uniform(kw, (fan_in, fan_out), jnp.float32, -bound, bound)
            b = jax.random.uniform(kb, (1, fan_out), jnp.float32, -bound, bound)
            return w, b  # stored as (in, out), i.e. W^T relative to torch

        self.wd_img, self.bd_img = linear_params(ks[0], ks[1], embed_dims, bottleneck_dim)
        self.wg_img, self.bg_img = linear_params(ks[2], ks[3], embed_dims, bottleneck_dim)
        self.wd_txt, self.bd_txt = linear_params(ks[4], ks[5], embed_dims, bottleneck_dim)
        self.wg_txt, self.bg_txt = linear_params(ks[6], ks[7], embed_dims, bottleneck_dim)
        self.wu, self.bu = linear_params(ks[8], ks[9], bottleneck_dim, embed_dims)

        # Fused [Wd | Wg] weights so the kernel issues one wide matmul per tile.
        self.wdg_img = jnp.concatenate([self.wd_img, self.wg_img], axis=1)
        self.bdg_img = jnp.concatenate([self.bd_img, self.bg_img], axis=1)
        self.wdg_txt = jnp.concatenate([self.wd_txt, self.wg_txt], axis=1)
        self.bdg_txt = jnp.concatenate([self.bd_txt, self.bg_txt], axis=1)

    def __call__(self, img_feat, text_feat):
        b, li, e = img_feat.shape
        _, lt, _ = text_feat.shape

        img_rows = img_feat.reshape(b * li, e)
        txt_rows = text_feat.reshape(b * lt, e)

        # TODO(synk): optionally fuse the two launches into one pallas_call with a
        # stacked per-modality weight slab; kept separate for clarity.
        img_out = _adapt_rows(img_rows, self.wdg_img, self.bdg_img, self.wu, self.bu)
        txt_out = _adapt_rows(txt_rows, self.wdg_txt, self.bdg_txt, self.wu, self.bu)

        return img_out.reshape(b, li, e), txt_out.reshape(b, lt, e)

    # pure-JAX reference for correctness checking
    def reference(self, img_feat, text_feat):
        hp = jax.lax.Precision.HIGHEST

        def gate(x, wd, bd, wg, bg):
            d = jnp.dot(x, wd, precision=hp) + bd
            g = jnp.dot(x, wg, precision=hp) + bg
            return jax.nn.silu(d) * g

        z_img = gate(img_feat, self.wd_img, self.bd_img, self.wg_img, self.bg_img)
        z_txt = gate(text_feat, self.wd_txt, self.bd_txt, self.wg_txt, self.bg_txt)
        z = jnp.concatenate([z_img, z_txt], axis=1)
        adapt = jnp.dot(z, self.wu, precision=hp) + self.bu
        li = img_feat.shape[1]
        return img_feat + adapt[:, :li, :], text_feat + adapt[:, li:, :]


if __name__ == "__main__":
    key = jax.random.PRNGKey(0)
    k_param, k_img, k_txt, k_big = jax.random.split(key, 4)

    # Small but lane-aligned shapes (E and BN multiples of 128, as in GroundingDINO).
    B, L_IMG, L_TXT = 2, 16, 8
    EMBED, BOTTLENECK = 256, 128

    layer = FeatureAdaptLayerPallas(EMBED, BOTTLENECK, k_param)

    img_feat = jax.random.normal(k_img, (B, L_IMG, EMBED), jnp.float32)
    text_feat = jax.random.normal(k_txt, (B, L_TXT, EMBED), jnp.float32)

    img_out, txt_out = layer(img_feat, text_feat)
    jax.block_until_ready((img_out, txt_out))

    img_ref, txt_ref = layer.reference(img_feat, text_feat)
    assert np.allclose(np.asarray(img_out), np.asarray(img_ref), atol=1e-4, rtol=1e-4)
    assert np.allclose(np.asarray(txt_out), np.asarray(txt_ref), atol=1e-4, rtol=1e-4)
    assert img_out.shape == (B, L_IMG, EMBED) and txt_out.shape == (B, L_TXT, EMBED)

    # Also exercise the multi-tile path with a partial last block (no padding needed).
    big = jax.random.normal(k_big, (300, EMBED), jnp.float32)
    big_out = _adapt_rows(big, layer.wdg_img, layer.bdg_img, layer.wu, layer.bu, tm=128)
    jax.block_until_ready(big_out)
    hp = jax.lax.Precision.HIGHEST
    d = jnp.dot(big, layer.wd_img, precision=hp) + layer.bd_img
    g = jnp.dot(big, layer.wg_img, precision=hp) + layer.bg_img
    big_ref = big + jnp.dot(jax.nn.silu(d) * g, layer.wu, precision=hp) + layer.bu
    assert np.allclose(np.asarray(big_out), np.asarray(big_ref), atol=1e-4, rtol=1e-4)

    print("KERNEL_OK")
</pallas_src>

<mosaic_0001>
module attributes {stable_mosaic.version = 11 : i64} {
  func.func @_adapt_kernel(%arg0: i32, %arg1: memref<32x256xf32, #tpu.memory_space<vmem>>, %arg2: memref<256x256xf32, #tpu.memory_space<vmem>>, %arg3: memref<1x256xf32, #tpu.memory_space<vmem>>, %arg4: memref<128x256xf32, #tpu.memory_space<vmem>>, %arg5: memref<1x256xf32, #tpu.memory_space<vmem>>, %arg6: memref<32x256xf32, #tpu.memory_space<vmem>>) attributes {dimension_semantics = [#tpu.dimension_semantics<parallel>], iteration_bounds = array<i64: 1>, scalar_prefetch = 0 : i64, scratch_operands = 0 : i64, tpu.core_type = #tpu.core_type<tc>, window_params = [{transform_indices = @transform_0, window_bounds = array<i64: 32, 256>}, {pipeline_mode = #tpu.pipeline_mode<synchronous>, transform_indices = @transform_1, window_bounds = array<i64: 256, 256>}, {pipeline_mode = #tpu.pipeline_mode<synchronous>, transform_indices = @transform_2, window_bounds = array<i64: 1, 256>}, {pipeline_mode = #tpu.pipeline_mode<synchronous>, transform_indices = @transform_3, window_bounds = array<i64: 128, 256>}, {pipeline_mode = #tpu.pipeline_mode<synchronous>, transform_indices = @transform_4, window_bounds = array<i64: 1, 256>}, {transform_indices = @transform_5, window_bounds = array<i64: 32, 256>}]} {
    %c0 = arith.constant 0 : index
    %c0_0 = arith.constant 0 : index
    %0 = vector.load %arg1[%c0, %c0_0] : memref<32x256xf32, #tpu.memory_space<vmem>>, vector<32x256xf32>
    %c0_1 = arith.constant 0 : index
    %c0_2 = arith.constant 0 : index
    %1 = vector.load %arg2[%c0_1, %c0_2] : memref<256x256xf32, #tpu.memory_space<vmem>>, vector<256x256xf32>
    %cst = arith.constant dense<0.000000e+00> : vector<32x256xf32>
    %2 = tpu.matmul %0, %1, %cst {dimension_numbers = #tpu.dot_dimension_numbers<[1], [0], [0], [1], [0, 0, 1, 1], [], []>} : vector<32x256xf32>, vector<256x256xf32>, vector<32x256xf32> -> vector<32x256xf32>
    %c0_3 = arith.constant 0 : index
    %c0_4 = arith.constant 0 : index
    %3 = vector.load %arg3[%c0_3, %c0_4] : memref<1x256xf32, #tpu.memory_space<vmem>>, vector<1x256xf32>
    %4 = vector.broadcast %3 : vector<1x256xf32> to vector<32x256xf32>
    %5 = arith.addf %2, %4 : vector<32x256xf32>
    %6 = vector.extract_strided_slice %5 {offsets = [0, 0], sizes = [32, 128], strides = [1, 1]} : vector<32x256xf32> to vector<32x128xf32>
    %7 = vector.extract_strided_slice %5 {offsets = [0, 128], sizes = [32, 128], strides = [1, 1]} : vector<32x256xf32> to vector<32x128xf32>
    %8 = arith.negf %6 : vector<32x128xf32>
    %9 = math.exp %8 : vector<32x128xf32>
    %cst_5 = arith.constant 1.000000e+00 : f32
    %10 = vector.broadcast %cst_5 : f32 to vector<32x128xf32>
    %11 = arith.addf %10, %9 : vector<32x128xf32>
    %12 = arith.divf %10, %11 : vector<32x128xf32>
    %13 = arith.mulf %6, %12 : vector<32x128xf32>
    %14 = arith.mulf %13, %7 : vector<32x128xf32>
    %c0_6 = arith.constant 0 : index
    %c0_7 = arith.constant 0 : index
    %15 = vector.load %arg4[%c0_6, %c0_7] : memref<128x256xf32, #tpu.memory_space<vmem>>, vector<128x256xf32>
    %cst_8 = arith.constant dense<0.000000e+00> : vector<32x256xf32>
    %16 = tpu.matmul %14, %15, %cst_8 {dimension_numbers = #tpu.dot_dimension_numbers<[1], [0], [0], [1], [0, 0, 1, 1], [], []>} : vector<32x128xf32>, vector<128x256xf32>, vector<32x256xf32> -> vector<32x256xf32>
    %c0_9 = arith.constant 0 : index
    %c0_10 = arith.constant 0 : index
    %17 = vector.load %arg5[%c0_9, %c0_10] : memref<1x256xf32, #tpu.memory_space<vmem>>, vector<1x256xf32>
    %18 = vector.broadcast %17 : vector<1x256xf32> to vector<32x256xf32>
    %19 = arith.addf %16, %18 : vector<32x256xf32>
    %20 = arith.addf %0, %19 : vector<32x256xf32>
    %c0_11 = arith.constant 0 : index
    %c0_12 = arith.constant 0 : index
    %21 = vector.load %arg6[%c0_11, %c0_12] : memref<32x256xf32, #tpu.memory_space<vmem>>, vector<32x256xf32>
    tpu.vector_store %arg6[%c0_11, %c0_12], %20 {strides = array<i32>} : memref<32x256xf32, #tpu.memory_space<vmem>>, vector<32x256xf32>,
    return
  }
  func.func @transform_0(%arg0: i32) -> (i32, i32) {
    %c0_i32 = arith.constant 0 : i32
    %c0_i32_0 = arith.constant 0 : i32
    return %arg0, %c0_i32 : i32, i32
  }
  func.func @transform_1(%arg0: i32) -> (i32, i32) {
    %c0_i32 = arith.constant 0 : i32
    %c0_i32_0 = arith.constant 0 : i32
    %c0_i32_1 = arith.constant 0 : i32
    return %c0_i32, %c0_i32_0 : i32, i32
  }
  func.func @transform_2(%arg0: i32) -> (i32, i32) {
    %c0_i32 = arith.constant 0 : i32
    %c0_i32_0 = arith.constant 0 : i32
    %c0_i32_1 = arith.constant 0 : i32
    return %c0_i32, %c0_i32_0 : i32, i32
  }
  func.func @transform_3(%arg0: i32) -> (i32, i32) {
    %c0_i32 = arith.constant 0 : i32
    %c0_i32_0 = arith.constant 0 : i32
    %c0_i32_1 = arith.constant 0 : i32
    return %c0_i32, %c0_i32_0 : i32, i32
  }
  func.func @transform_4(%arg0: i32) -> (i32, i32) {
    %c0_i32 = arith.constant 0 : i32
    %c0_i32_0 = arith.constant 0 : i32
    %c0_i32_1 = arith.constant 0 : i32
    return %c0_i32, %c0_i32_0 : i32, i32
  }
  func.func @transform_5(%arg0: i32) -> (i32, i32) {
    %c0_i32 = arith.constant 0 : i32
    %c0_i32_0 = arith.constant 0 : i32
    return %arg0, %c0_i32 : i32, i32
  }
}

</mosaic_0001>

<bundles_post_ra>
// kernel: tpu_custom_call.1
= control target key start
LH: loop header
LB: loop body
LE: loop exit
PB: predicated region body
PF: predicated region fallthrough
CT: control target
= control target key end

     0   :  { %10 = vsyncpa [#allocation3], 0  ;;  %s797_s0 = inlined_call_operand.hbm [shape: f32[32,256], index: 0, kind: input, shape index: {}]   ;;  %s798_s1 = inlined_call_operand.hbm [shape: f32[256,256], index: 1, kind: input, shape index: {}]   ;;  %s799_s2 = inlined_call_operand.vmem [shape: f32[1,256], index: 2, kind: input, shape index: {}]   ;;  %s800_s3 = inlined_call_operand.hbm [shape: f32[128,256], index: 3, kind: input, shape index: {}]   ;;  %s801_s4 = inlined_call_operand.vmem [shape: f32[1,256], index: 4, kind: input, shape index: {}]   ;;  %s802_s5 = inlined_call_operand.hbm [shape: f32[32,256], index: 5, kind: output, shape index: {}]  }
   0x1   :  { %11 = vsyncpa [#allocation6], 0 }
   0x2   :  { %12 = vsyncpa [#allocation4], 0  ;;  %s651_s18 = smov [#allocation5]   ;;  %s652_s20 = smov [#allocation2]  }
   0x3   :  { %s30_s19 = sshll.u32 %s651_s18, 4  ;;  %s18_s21 = sshll.u32 %s652_s20, 4  ;;  %s31_s19 = int_to_ptr.vmem [resolvable:$true] %s30_s19  ;;  %s688_s21 = int_to_ptr.vmem [resolvable:$true] %s18_s21 }
   0x4   :  { %s557_s24 = scalar_lea.hbm %s798_s1, 8192 }
   0x5   :  { %p558_p0 = scmp.ne.s32.totalorder %s798_s1, %s557_s24  ;;  %p561_p1 = scmp.lt.u32.totalorder %s557_s24, %s798_s1 }
   0x7   :  { %p563_p2 = pnand %p561_p1, %p558_p0 }
   0x9   :  { %566 = shalt.err (!%p563_p2)
}
   0xa   :  { %s567_s29 = scalar_lea.vmem %s31_s19, 8192  ;;  %p572_p4 = scmp.lt.s32.totalorder %s31_s19, %s31_s19 }
   0xb   :  { %p568_p3 = scmp.ne.s32.totalorder %s31_s19, %s567_s29  ;;  %p573_p5 = scmp.lt.s32.totalorder %s567_s29, %s567_s29 }
   0xd   :  { %p574_p6 = por %p573_p5, %p572_p4 }
   0xf   :  { %p575_p7 = pnand %p574_p6, %p568_p3 }
  0x11   :  { %578 = shalt.err (!%p575_p7)
}
  0x12   :  { %s653_s30 = smov 256   ;;  %s654_s6 = smov 16  }
  0x13   :  { %36 = dma.hbm_to_vmem [thread:$0]  %s798_s1, 8192, %s31_s19, [#allocation6], %s653_s30, %s653_s30, %s654_s6  }
  0x14   :  { %s579_s11 = scalar_lea.hbm %s797_s0, 1024 }
  0x15   :  { %p580_p8 = scmp.ne.s32.totalorder %s797_s0, %s579_s11  ;;  %p583_p9 = scmp.lt.u32.totalorder %s579_s11, %s797_s0 }
  0x17   :  { %p585_p10 = pnand %p583_p9, %p580_p8 }
  0x19   :  { %588 = shalt.err (!%p585_p10)
}
  0x1a   :  { %s589_s16 = scalar_lea.vmem %s688_s21, 1024  ;;  %p594_p12 = scmp.lt.s32.totalorder %s688_s21, %s688_s21 }
  0x1b   :  { %p590_p11 = scmp.ne.s32.totalorder %s688_s21, %s589_s16  ;;  %p595_p13 = scmp.lt.s32.totalorder %s589_s16, %s589_s16 }
  0x1d   :  { %p596_p0 = por %p595_p13, %p594_p12 }
  0x1f   :  { %p597_p1 = pnand %p596_p0, %p590_p11 }
  0x21   :  { %600 = shalt.err (!%p597_p1)
}
  0x22   :  { %24 = dma.hbm_to_vmem [thread:$0]  %s797_s0, 1024, %s688_s21, [#allocation3], %s653_s30, %s653_s30, %s654_s6  }
  0x23   :  { %s655_s18 = smov [#allocation7]   ;;  %s601_s23 = scalar_lea.hbm %s800_s3, 4096 }
  0x24   :  { %s44_s19 = sshll.u32 %s655_s18, 4  ;;  %p602_p2 = scmp.ne.s32.totalorder %s800_s3, %s601_s23  ;;  %s45_s19 = int_to_ptr.vmem [resolvable:$true] %s44_s19 }
  0x25   :  { %p605_p3 = scmp.lt.u32.totalorder %s601_s23, %s800_s3 }
  0x27   :  { %p607_p4 = pnand %p605_p3, %p602_p2 }
  0x29   :  { %610 = shalt.err (!%p607_p4)
}
  0x2a   :  { %s611_s28 = scalar_lea.vmem %s45_s19, 4096  ;;  %p616_p6 = scmp.lt.s32.totalorder %s45_s19, %s45_s19 }
  0x2b   :  { %p612_p5 = scmp.ne.s32.totalorder %s45_s19, %s611_s28  ;;  %p617_p7 = scmp.lt.s32.totalorder %s611_s28, %s611_s28 }
  0x2d   :  { %p618_p8 = por %p617_p7, %p616_p6 }
  0x2f   :  { %p619_p9 = pnand %p618_p8, %p612_p5 }
  0x31   :  { %622 = shalt.err (!%p619_p9)
}
  0x32   :  { %50 = dma.hbm_to_vmem [thread:$0]  %s800_s3, 4096, %s45_s19, [#allocation6], %s653_s30, %s653_s30, %s654_s6  }
  0x33   :  { %645 = dma.done.wait [#allocation3], 1024  }
  0x34   :  { %646 = vsyncadd [#allocation3], 4294966272 }
  0x35   :  { %647 = dma.done.wait [#allocation6], 12288  }
  0x36   :  { %648 = vsyncadd [#allocation6], 4294955008  ;;  %v71_v0 = vld [vmem:[#allocation5 + $0x8] sm:$0xff]  ;;  %v73_v1 = vld [vmem:[#allocation5 + $0x18] sm:$0xff] }
  0x37   :  { %v70_v2 = vld [vmem:[#allocation5] sm:$0xff]  ;;  %v438_v3 = vpack.c.bf16 %v73_v1, %v71_v0  ;;  %v72_v4 = vld [vmem:[#allocation5 + $0x10] sm:$0xff]  ;;  %v75_v5 = vld [vmem:[#allocation5 + $0x28] sm:$0xff] }
  0x38   :  { %v77_v6 = vld [vmem:[#allocation5 + $0x38] sm:$0xff]  ;;  %v440_v7 = vpack.c.bf16 %v72_v4, %v70_v2  ;;  %v74_v9 = vld [vmem:[#allocation5 + $0x20] sm:$0xff]  ;;  %v76_v10 = vld [vmem:[#allocation5 + $0x30] sm:$0xff] }
  0x39   :  { %v442_v8 = vpack.c.bf16 %v77_v6, %v75_v5  ;;  %v79_v11 = vld [vmem:[#allocation5 + $0x48] sm:$0xff]  ;;  %439 = vmatprep.subr.bf16.mxu0 %v438_v3  ;;  %v81_v12 = vld [vmem:[#allocation5 + $0x58] sm:$0xff]  ;;  %v444_v13 = vpack.c.bf16 %v76_v10, %v74_v9  ;;  %v78_v15 = vld [vmem:[#allocation5 + $0x40] sm:$0xff] }
  0x3a   :  { %441 = vmatpush1.bf16.msra.mxu0 %v440_v7  ;;  %v446_v14 = vpack.c.bf16 %v81_v12, %v79_v11  ;;  %v80_v16 = vld [vmem:[#allocation5 + $0x50] sm:$0xff]  ;;  %v83_v17 = vld [vmem:[#allocation5 + $0x68] sm:$0xff]  ;;  %v85_v18 = vld [vmem:[#allocation5 + $0x78] sm:$0xff] }
  0x3b   :  { %443 = vmatprep.subr.bf16.mxu0 %v442_v8  ;;  %v448_v19 = vpack.c.bf16 %v80_v16, %v78_v15  ;;  %v450_v20 = vpack.c.bf16 %v85_v18, %v83_v17  ;;  %v82_v21 = vld [vmem:[#allocation5 + $0x60] sm:$0xff]  ;;  %v84_v22 = vld [vmem:[#allocation5 + $0x70] sm:$0xff]  ;;  %v87_v23 = vld [vmem:[#allocation5 + $0x88] sm:$0xff] }
  0x3c   :  { %v89_v24 = vld [vmem:[#allocation5 + $0x98] sm:$0xff]  ;;  %v452_v25 = vpack.c.bf16 %v84_v22, %v82_v21  ;;  %v86_v27 = vld [vmem:[#allocation5 + $0x80] sm:$0xff]  ;;  %v88_v28 = vld [vmem:[#allocation5 + $0x90] sm:$0xff] }
  0x3d   :  { %v454_v26 = vpack.c.bf16 %v89_v24, %v87_v23  ;;  %v91_v29 = vld [vmem:[#allocation5 + $0xa8] sm:$0xff]  ;;  %v93_v30 = vld [vmem:[#allocation5 + $0xb8] sm:$0xff]  ;;  %v456_v31 = vpack.c.bf16 %v88_v28, %v86_v27  ;;  %v90_v33 = vld [vmem:[#allocation5 + $0xa0] sm:$0xff] }
  0x3e   :  { %445 = vmatpush1.bf16.msra.mxu0 %v444_v13  ;;  %v458_v32 = vpack.c.bf16 %v93_v30, %v91_v29  ;;  %v92_v34 = vld [vmem:[#allocation5 + $0xb0] sm:$0xff]  ;;  %v95_v35 = vld [vmem:[#allocation5 + $0xc8] sm:$0xff]  ;;  %v97_v36 = vld [vmem:[#allocation5 + $0xd8] sm:$0xff] }
  0x3f   :  { %447 = vmatprep.subr.bf16.mxu0 %v446_v14  ;;  %v460_v37 = vpack.c.bf16 %v92_v34, %v90_v33  ;;  %v462_v38 = vpack.c.bf16 %v97_v36, %v95_v35  ;;  %v94_v39 = vld [vmem:[#allocation5 + $0xc0] sm:$0xff]  ;;  %v96_v40 = vld [vmem:[#allocation5 + $0xd0] sm:$0xff]  ;;  %v740_v41 = vld [vmem:[#allocation2 + $0x8] sm:$0xff] }
  0x40   :  { %v99_v42 = vld [vmem:[#allocation5 + $0xe8] sm:$0xff]  ;;  %v101_v43 = vld [vmem:[#allocation5 + $0xf8] sm:$0xff]  ;;  %210 = vmatprep.mubr.f32.mxu0 %v740_v41  ;;  %v464_v44 = vpack.c.bf16 %v96_v40, %v94_v39  ;;  %v98_v46 = vld [vmem:[#allocation5 + $0xe0] sm:$0xff] }
  0x41   :  { %v466_v45 = vpack.c.bf16 %v101_v43, %v99_v42  ;;  %v100_v47 = vld [vmem:[#allocation5 + $0xf0] sm:$0xff]  ;;  %v103_v48 = vld [vmem:[#allocation5 + $0x108] sm:$0xff]  ;;  %v105_v49 = vld [vmem:[#allocation5 + $0x118] sm:$0xff] }
  0x42   :  { %449 = vmatpush1.bf16.msra.mxu0 %v448_v19  ;;  %v468_v50 = vpack.c.bf16 %v100_v47, %v98_v46  ;;  %v470_v51 = vpack.c.bf16 %v105_v49, %v103_v48  ;;  %v102_v52 = vld [vmem:[#allocation5 + $0x100] sm:$0xff]  ;;  %v104_v53 = vld [vmem:[#allocation5 + $0x110] sm:$0xff]  ;;  %v107_v54 = vld [vmem:[#allocation5 + $0x128] sm:$0xff] }
  0x43   :  { %451 = vmatprep.subr.bf16.mxu0 %v450_v20  ;;  %v109_v55 = vld [vmem:[#allocation5 + $0x138] sm:$0xff]  ;;  %v472_v56 = vpack.c.bf16 %v104_v53, %v102_v52  ;;  %v106_v58 = vld [vmem:[#allocation5 + $0x120] sm:$0xff]  ;;  %v108_v59 = vld [vmem:[#allocation5 + $0x130] sm:$0xff] }
  0x44   :  { %v474_v57 = vpack.c.bf16 %v109_v55, %v107_v54  ;;  %v111_v60 = vld [vmem:[#allocation5 + $0x148] sm:$0xff]  ;;  %v113_v61 = vld [vmem:[#allocation5 + $0x158] sm:$0xff]  ;;  %v476_v62 = vpack.c.bf16 %v108_v59, %v106_v58  ;;  %v110_v0 = vld [vmem:[#allocation5 + $0x140] sm:$0xff] }
  0x45   :  { %v478_v63 = vpack.c.bf16 %v113_v61, %v111_v60  ;;  %v112_v1 = vld [vmem:[#allocation5 + $0x150] sm:$0xff]  ;;  %v115_v2 = vld [vmem:[#allocation5 + $0x168] sm:$0xff]  ;;  %v117_v3 = vld [vmem:[#allocation5 + $0x178] sm:$0xff] }
  0x46   :  { %453 = vmatpush1.bf16.msra.mxu0 %v452_v25  ;;  %v480_v4 = vpack.c.bf16 %v112_v1, %v110_v0  ;;  %v482_v5 = vpack.c.bf16 %v117_v3, %v115_v2  ;;  %v114_v6 = vld [vmem:[#allocation5 + $0x160] sm:$0xff]  ;;  %v116_v7 = vld [vmem:[#allocation5 + $0x170] sm:$0xff]  ;;  %v119_v8 = vld [vmem:[#allocation5 + $0x188] sm:$0xff] }
  0x47   :  { %455 = vmatprep.subr.bf16.mxu0 %v454_v26  ;;  %v121_v9 = vld [vmem:[#allocation5 + $0x198] sm:$0xff]  ;;  %v484_v10 = vpack.c.bf16 %v116_v7, %v114_v6  ;;  %v118_v12 = vld [vmem:[#allocation5 + $0x180] sm:$0xff]  ;;  %v120_v13 = vld [vmem:[#allocation5 + $0x190] sm:$0xff] }
  0x48   :  { %v486_v11 = vpack.c.bf16 %v121_v9, %v119_v8  ;;  %v123_v14 = vld [vmem:[#allocation5 + $0x1a8] sm:$0xff]  ;;  %v125_v15 = vld [vmem:[#allocation5 + $0x1b8] sm:$0xff]  ;;  %v488_v16 = vpack.c.bf16 %v120_v13, %v118_v12  ;;  %v122_v18 = vld [vmem:[#allocation5 + $0x1a0] sm:$0xff] }
  0x49   :  { %v490_v17 = vpack.c.bf16 %v125_v15, %v123_v14  ;;  %v124_v19 = vld [vmem:[#allocation5 + $0x1b0] sm:$0xff]  ;;  %v127_v20 = vld [vmem:[#allocation5 + $0x1c8] sm:$0xff]  ;;  %v129_v21 = vld [vmem:[#allocation5 + $0x1d8] sm:$0xff] }
  0x4a   :  { %457 = vmatpush1.bf16.msra.mxu0 %v456_v31  ;;  %v492_v22 = vpack.c.bf16 %v124_v19, %v122_v18  ;;  %v494_v23 = vpack.c.bf16 %v129_v21, %v127_v20  ;;  %v126_v24 = vld [vmem:[#allocation5 + $0x1c0] sm:$0xff]  ;;  %v128_v25 = vld [vmem:[#allocation5 + $0x1d0] sm:$0xff]  ;;  %v131_v26 = vld [vmem:[#allocation5 + $0x1e8] sm:$0xff] }
  0x4b   :  { %459 = vmatprep.subr.bf16.mxu0 %v458_v32  ;;  %v133_v27 = vld [vmem:[#allocation5 + $0x1f8] sm:$0xff]  ;;  %v496_v28 = vpack.c.bf16 %v128_v25, %v126_v24  ;;  %v130_v30 = vld [vmem:[#allocation5 + $0x1e0] sm:$0xff]  ;;  %v132_v31 = vld [vmem:[#allocation5 + $0x1f0] sm:$0xff]  ;;  %v656_v25 = vmov 0.0  }
  0x4c   :  { %v498_v29 = vpack.c.bf16 %v133_v27, %v131_v26  ;;  %v500_v32 = vpack.c.bf16 %v132_v31, %v130_v30  ;;  %v743_v33 = vld [vmem:[#allocation2] sm:$0xff]  ;;  %v745_v34 = vld [vmem:[#allocation2 + $0x18] sm:$0xff]  ;;  %v749_v35 = vld [vmem:[#allocation2 + $0x10] sm:$0xff]  ;;  %375 = vmatprep.mubr.f32.mxu1 %v656_v25  ;;  %v136_v26 = vlaneseq }
  0x4d   :  { %v751_v36 = vld [vmem:[#allocation2 + $0x28] sm:$0xff]  ;;  %v761_v39 = vld [vmem:[#allocation2 + $0x30] sm:$0xff]  ;;  %v270_v42 = vld [vmem:[#allocation7 + $0x18] sm:$0xff] }
  0x4e   :  { %461 = vmatpush1.bf16.msra.mxu0 %v460_v37  ;;  %v755_v37 = vld [vmem:[#allocation2 + $0x20] sm:$0xff]  ;;  %v268_v40 = vld [vmem:[#allocation7 + $0x8] sm:$0xff]  ;;  %v274_v48 = vld [vmem:[#allocation7 + $0x38] sm:$0xff]  ;;  %v764_v27 = vshrl.u32 %v136_v26, 7 }
  0x4f   :  { %463 = vmatprep.subr.bf16.mxu0 %v462_v38  ;;  %v757_v38 = vld [vmem:[#allocation2 + $0x38] sm:$0xff]  ;;  %v502_v43 = vpack.c.bf16 %v270_v42, %v268_v40  ;;  %v272_v47 = vld [vmem:[#allocation7 + $0x28] sm:$0xff] }
  0x50   :  { %v506_v49 = vpack.c.bf16 %v274_v48, %v272_v47  ;;  %v276_v53 = vld [vmem:[#allocation7 + $0x48] sm:$0xff]  ;;  %v278_v54 = vld [vmem:[#allocation7 + $0x58] sm:$0xff] }
  0x51   :  { %503 = vmatprep.subr.bf16.mxu1 %v502_v43  ;;  %v510_v55 = vpack.c.bf16 %v278_v54, %v276_v53  ;;  %v280_v59 = vld [vmem:[#allocation7 + $0x68] sm:$0xff]  ;;  %v282_v60 = vld [vmem:[#allocation7 + $0x78] sm:$0xff] }
  0x52   :  { %465 = vmatpush1.bf16.msra.mxu0 %v464_v44  ;;  %v267_v44 = vld [vmem:[#allocation7] sm:$0xff]  ;;  %v514_v61 = vpack.c.bf16 %v282_v60, %v280_v59  ;;  %v284_v1 = vld [vmem:[#allocation7 + $0x88] sm:$0xff]  ;;  %v286_v2 = vld [vmem:[#allocation7 + $0x98] sm:$0xff]  ;;  %v142_v59 = vsub.s32 1, %v764_v27 }
  0x53   :  { %467 = vmatprep.subr.bf16.mxu0 %v466_v45  ;;  %v269_v45 = vld [vmem:[#allocation7 + $0x10] sm:$0xff]  ;;  %v518_v3 = vpack.c.bf16 %v286_v2, %v284_v1  ;;  %v288_v7 = vld [vmem:[#allocation7 + $0xa8] sm:$0xff]  ;;  %v290_v8 = vld [vmem:[#allocation7 + $0xb8] sm:$0xff] }
  0x54   :  { %v504_v46 = vpack.c.bf16 %v269_v45, %v267_v44  ;;  %v522_v9 = vpack.c.bf16 %v290_v8, %v288_v7  ;;  %v292_v13 = vld [vmem:[#allocation7 + $0xc8] sm:$0xff]  ;;  %v294_v14 = vld [vmem:[#allocation7 + $0xd8] sm:$0xff] }
  0x55   :  { %v526_v15 = vpack.c.bf16 %v294_v14, %v292_v13  ;;  %v296_v19 = vld [vmem:[#allocation7 + $0xe8] sm:$0xff]  ;;  %v298_v20 = vld [vmem:[#allocation7 + $0xf8] sm:$0xff] }
  0x56   :  { %469 = vmatpush1.bf16.msra.mxu0 %v468_v50  ;;  %505 = vmatpush1.bf16.msra.mxu1 %v504_v46  ;;  %v271_v50 = vld [vmem:[#allocation7 + $0x20] sm:$0xff]  ;;  %v530_v21 = vpack.c.bf16 %v298_v20, %v296_v19 }
  0x57   :  { %471 = vmatprep.subr.bf16.mxu0 %v470_v51  ;;  %v273_v51 = vld [vmem:[#allocation7 + $0x30] sm:$0xff]  ;;  %507 = vmatprep.subr.bf16.mxu1 %v506_v49 }
  0x58   :  { %v508_v52 = vpack.c.bf16 %v273_v51, %v271_v50 }
  0x5a   :  { %473 = vmatpush1.bf16.msra.mxu0 %v472_v56  ;;  %509 = vmatpush1.bf16.msra.mxu1 %v508_v52  ;;  %v275_v56 = vld [vmem:[#allocation7 + $0x40] sm:$0xff] }
  0x5b   :  { %475 = vmatprep.subr.bf16.mxu0 %v474_v57  ;;  %v277_v57 = vld [vmem:[#allocation7 + $0x50] sm:$0xff]  ;;  %511 = vmatprep.subr.bf16.mxu1 %v510_v55 }
  0x5c   :  { %v512_v58 = vpack.c.bf16 %v277_v57, %v275_v56 }
  0x5e   :  { %477 = vmatpush1.bf16.msra.mxu0 %v476_v62  ;;  %513 = vmatpush1.bf16.msra.mxu1 %v512_v58  ;;  %v279_v62 = vld [vmem:[#allocation7 + $0x60] sm:$0xff] }
  0x5f   :  { %479 = vmatprep.subr.bf16.mxu0 %v478_v63  ;;  %v281_v63 = vld [vmem:[#allocation7 + $0x70] sm:$0xff]  ;;  %515 = vmatprep.subr.bf16.mxu1 %v514_v61 }
  0x60   :  { %v516_v0 = vpack.c.bf16 %v281_v63, %v279_v62 }
  0x62   :  { %481 = vmatpush1.bf16.msra.mxu0 %v480_v4  ;;  %517 = vmatpush1.bf16.msra.mxu1 %v516_v0  ;;  %v283_v4 = vld [vmem:[#allocation7 + $0x80] sm:$0xff] }
  0x63   :  { %483 = vmatprep.subr.bf16.mxu0 %v482_v5  ;;  %v285_v5 = vld [vmem:[#allocation7 + $0x90] sm:$0xff]  ;;  %519 = vmatprep.subr.bf16.mxu1 %v518_v3 }
  0x64   :  { %v520_v6 = vpack.c.bf16 %v285_v5, %v283_v4 }
  0x66   :  { %485 = vmatpush1.bf16.msra.mxu0 %v484_v10  ;;  %521 = vmatpush1.bf16.msra.mxu1 %v520_v6  ;;  %v287_v10 = vld [vmem:[#allocation7 + $0xa0] sm:$0xff] }
  0x67   :  { %487 = vmatprep.subr.bf16.mxu0 %v486_v11  ;;  %v289_v11 = vld [vmem:[#allocation7 + $0xb0] sm:$0xff]  ;;  %523 = vmatprep.subr.bf16.mxu1 %v522_v9 }
  0x68   :  { %v524_v12 = vpack.c.bf16 %v289_v11, %v287_v10 }
  0x6a   :  { %489 = vmatpush1.bf16.msra.mxu0 %v488_v16  ;;  %525 = vmatpush1.bf16.msra.mxu1 %v524_v12  ;;  %v291_v16 = vld [vmem:[#allocation7 + $0xc0] sm:$0xff] }
  0x6b   :  { %491 = vmatprep.subr.bf16.mxu0 %v490_v17  ;;  %v293_v17 = vld [vmem:[#allocation7 + $0xd0] sm:$0xff]  ;;  %527 = vmatprep.subr.bf16.mxu1 %v526_v15 }
  0x6c   :  { %v528_v18 = vpack.c.bf16 %v293_v17, %v291_v16  ;;  %v299_v17 = vld [vmem:[%s801_s4] sm:$0x3]  ;;  %s657_s4 = smov [#allocation8]  }
  0x6d   :  { %v308_v19 = vrot.slane %v299_v17, %v142_v59  ;;  %s421_s8 = sshll.u32 %s657_s4, 4  ;;  %s422_s8 = int_to_ptr.vmem [resolvable:$true] %s421_s8 }
  0x6e   :  { %493 = vmatpush1.bf16.msra.mxu0 %v492_v22  ;;  %529 = vmatpush1.bf16.msra.mxu1 %v528_v18  ;;  %v295_v22 = vld [vmem:[#allocation7 + $0xe0] sm:$0xff]  ;;  %s623_s9 = scalar_lea.vmem %s422_s8, 1024  ;;  %p628_p11 = scmp.lt.s32.totalorder %s422_s8, %s422_s8 }
  0x6f   :  { %495 = vmatprep.subr.bf16.mxu0 %v494_v23  ;;  %v297_v23 = vld [vmem:[#allocation7 + $0xf0] sm:$0xff]  ;;  %531 = vmatprep.subr.bf16.mxu1 %v530_v21  ;;  %p624_p10 = scmp.ne.s32.totalorder %s422_s8, %s623_s9  ;;  %p629_p12 = scmp.lt.s32.totalorder %s623_s9, %s623_s9 }
  0x70   :  { %v532_v24 = vpack.c.bf16 %v297_v23, %v295_v22 }
  0x71   :  { %p630_p13 = por %p629_p12, %p628_p11 }
  0x72   :  { %497 = vmatpush1.bf16.msra.mxu0 %v496_v28  ;;  %533 = vmatpush1.bf16.msra.mxu1 %v532_v24  ;;  %v138_v28 = vsub.s32 0, %v764_v27 }
  0x73   :  { %499 = vmatprep.subr.bf16.mxu0 %v498_v29  ;;  %v134_v29 = vld [vmem:[%s799_s2] sm:$0x3]  ;;  %p631_p0 = pnand %p630_p13, %p624_p10 }
  0x74   :  { %v139_v30 = vrot.slane %v134_v29, %v138_v28  ;;  %v143_v62 = vrot.slane %v134_v29, %v142_v59  ;;  %v304_v18 = vrot.slane %v299_v17, %v138_v28 }
  0x76   :  { %501 = vmatpush1.bf16.msra.mxu0 %v500_v32 }
  0x79   :  { %211 = vmatmul.mubr.f32.vlgmr.msra.gmra.mrb[0].mxu0 %v743_v33 }
  0x7a   :  { %216 = vmatprep.mubr.f32.mxu0 %v745_v34 }
  0x7d   :  { %217 = vmatmul.mubr.f32.gmra.mrb[2].mxu0 %v749_v35 }
  0x7e   :  { %222 = vmatprep.mubr.f32.mxu0 %v751_v36 }
  0x81   :  { %223 = vmatmul.mubr.f32.gmra.mrb[4].mxu0 %v755_v37 }
  0x82   :  { %228 = vmatprep.mubr.f32.mxu0 %v757_v38 }
  0x85   :  { %229 = vmatmul.mubr.f32.gmra.mrb[6].mxu0 %v761_v39 }
 0x14c   :  { %v212_v31 = vpop.f32.mrb[0].mxu0 }
 0x14d   :  { %v213_v32 = vadd.f32 %v212_v31, %v139_v30  ;;  %v214_v40 = vpop.f32.mrb[1].mxu0 }
 0x14e   :  { %v215_v3 = vadd.f32 %v214_v40, %v143_v62 }
 0x14f   :  { %v434_v42 = vmul.f32 -1.442695, %v213_v32 }
 0x150   :  { %v218_v43 = vpop.f32.mrb[2].mxu0 }
 0x151   :  { %541 = vpow2.f32 %v434_v42  ;;  %v219_v44 = vadd.f32 %v218_v43, %v139_v30  ;;  %v220_v45 = vpop.f32.mrb[3].mxu0 }
 0x152   :  { %v221_v7 = vadd.f32 %v220_v45, %v143_v62 }
 0x153   :  { %v435_v46 = vmul.f32 -1.442695, %v219_v44 }
 0x154   :  { %v224_v47 = vpop.f32.mrb[4].mxu0 }
 0x155   :  { %543 = vpow2.f32 %v435_v46  ;;  %v225_v48 = vadd.f32 %v224_v47, %v139_v30  ;;  %v226_v49 = vpop.f32.mrb[5].mxu0 }
 0x156   :  { %v227_v11 = vadd.f32 %v226_v49, %v143_v62 }
 0x157   :  { %v436_v50 = vmul.f32 -1.442695, %v225_v48 }
 0x158   :  { %v230_v51 = vpop.f32.mrb[6].mxu0 }
 0x159   :  { %545 = vpow2.f32 %v436_v50  ;;  %v231_v52 = vadd.f32 %v230_v51, %v139_v30  ;;  %v232_v53 = vpop.f32.mrb[7].mxu0 }
 0x15a   :  { %v233_v15 = vadd.f32 %v232_v53, %v143_v62 }
 0x15b   :  { %v542_v54 = vpop.eup %541  ;;  %v437_v55 = vmul.f32 -1.442695, %v231_v52 }
 0x15c   :  { %v247_v56 = vadd.f32 1.0, %v542_v54 }
 0x15d   :  { %547 = vpow2.f32 %v437_v55 }
 0x15e   :  { %549 = vrcp.f32 %v247_v56 }
 0x15f   :  { %v544_v57 = vpop.eup %543 }
 0x160   :  { %v248_v58 = vadd.f32 1.0, %v544_v57 }
 0x162   :  { %551 = vrcp.f32 %v248_v58 }
 0x163   :  { %v546_v60 = vpop.eup %545 }
 0x164   :  { %v249_v61 = vadd.f32 1.0, %v546_v60 }
 0x166   :  { %553 = vrcp.f32 %v249_v61 }
 0x167   :  { %v548_v63 = vpop.eup %547 }
 0x168   :  { %v550_v0 = vpop.eup %549  ;;  %v250_v1 = vadd.f32 1.0, %v548_v63 }
 0x169   :  { %v259_v2 = vmul.f32 %v550_v0, %v213_v32 }
 0x16a   :  { %555 = vrcp.f32 %v250_v1 }
 0x16b   :  { %v263_v4 = vmul.f32 %v259_v2, %v215_v3 }
 0x16c   :  { %v552_v5 = vpop.eup %551 }
 0x16d   :  { %v260_v6 = vmul.f32 %v552_v5, %v219_v44  ;;  %376 = vmatmul.mubr.f32.vlgmr.msra.gmra.mrb[0].mxu1 %v263_v4 }
 0x16e   :  { %381 = vmatprep.mubr.f32.mxu1 %v656_v25 }
 0x16f   :  { %v264_v8 = vmul.f32 %v260_v6, %v221_v7 }
 0x170   :  { %v554_v9 = vpop.eup %553 }
 0x171   :  { %v261_v10 = vmul.f32 %v554_v9, %v225_v48  ;;  %382 = vmatmul.mubr.f32.gmra.mrb[2].mxu1 %v264_v8 }
 0x172   :  { %387 = vmatprep.mubr.f32.mxu1 %v656_v25 }
 0x173   :  { %v265_v12 = vmul.f32 %v261_v10, %v227_v11 }
 0x174   :  { %v556_v13 = vpop.eup %555 }
 0x175   :  { %v262_v14 = vmul.f32 %v556_v13, %v231_v52  ;;  %388 = vmatmul.mubr.f32.gmra.mrb[4].mxu1 %v265_v12 }
 0x176   :  { %393 = vmatprep.mubr.f32.mxu1 %v656_v25 }
 0x177   :  { %v266_v16 = vmul.f32 %v262_v14, %v233_v15 }
 0x179   :  { %394 = vmatmul.mubr.f32.gmra.mrb[6].mxu1 %v266_v16 }
 0x240   :  { %v377_v20 = vpop.f32.mrb[0].mxu1 }
 0x241   :  { %v378_v21 = vadd.f32 %v377_v20, %v304_v18  ;;  %v379_v22 = vpop.f32.mrb[1].mxu1 }
 0x242   :  { %v380_v23 = vadd.f32 %v379_v22, %v308_v19 }
 0x243   :  { %v400_v24 = vadd.f32 %v378_v21, %v743_v33 }
 0x244   :  { %v401_v26 = vadd.f32 %v380_v23, %v740_v41  ;;  %v383_v27 = vpop.f32.mrb[2].mxu1 }
 0x245   :  { %408 = vst [vmem:[#allocation8] sm:$0xff] %v400_v24  ;;  %v384_v29 = vadd.f32 %v383_v27, %v304_v18  ;;  %v385_v25 = vpop.f32.mrb[3].mxu1 }
 0x246   :  { %409 = vst [vmem:[#allocation8 + $0x8] sm:$0xff] %v401_v26  ;;  %v386_v30 = vadd.f32 %v385_v25, %v308_v19 }
 0x247   :  { %v402_v31 = vadd.f32 %v384_v29, %v749_v35 }
 0x248   :  { %v403_v32 = vadd.f32 %v386_v30, %v745_v34  ;;  %v389_v28 = vpop.f32.mrb[4].mxu1 }
 0x249   :  { %410 = vst [vmem:[#allocation8 + $0x10] sm:$0xff] %v402_v31  ;;  %v390_v40 = vadd.f32 %v389_v28, %v304_v18  ;;  %v391_v42 = vpop.f32.mrb[5].mxu1 }
 0x24a   :  { %411 = vst [vmem:[#allocation8 + $0x18] sm:$0xff] %v403_v32  ;;  %v392_v43 = vadd.f32 %v391_v42, %v308_v19 }
 0x24b   :  { %v404_v33 = vadd.f32 %v390_v40, %v755_v37 }
 0x24c   :  { %v405_v41 = vadd.f32 %v392_v43, %v751_v36  ;;  %v395_v44 = vpop.f32.mrb[6].mxu1 }
 0x24d   :  { %412 = vst [vmem:[#allocation8 + $0x20] sm:$0xff] %v404_v33  ;;  %v396_v45 = vadd.f32 %v395_v44, %v304_v18  ;;  %v397_v46 = vpop.f32.mrb[7].mxu1 }
 0x24e   :  { %413 = vst [vmem:[#allocation8 + $0x28] sm:$0xff] %v405_v41  ;;  %v398_v35 = vadd.f32 %v397_v46, %v308_v19 }
 0x24f   :  { %v406_v34 = vadd.f32 %v396_v45, %v761_v39 }
 0x250   :  { %v407_v47 = vadd.f32 %v398_v35, %v757_v38 }
 0x251   :  { %414 = vst [vmem:[#allocation8 + $0x30] sm:$0xff] %v406_v34 }
 0x252   :  { %415 = vst [vmem:[#allocation8 + $0x38] sm:$0xff] %v407_v47 }
 0x253   :  { %634 = shalt.err (!%p631_p0)
}
 0x254   :  { %s635_s12 = scalar_lea.hbm %s802_s5, 1024 }
 0x255   :  { %p636_p1 = scmp.ne.s32.totalorder %s802_s5, %s635_s12  ;;  %p639_p2 = scmp.lt.u32.totalorder %s635_s12, %s802_s5 }
 0x257   :  { %p641_p3 = pnand %p639_p2, %p636_p1 }
 0x259   :  { %644 = shalt.err (!%p641_p3)
}
 0x25a   :  { %427 = dma.vmem_to_hbm [thread:$0]  %s422_s8, 1024, %s802_s5, [#allocation4], %s653_s30, %s653_s30, %s654_s6  }
 0x25b   :  { %649 = dma.done.wait [#allocation4], 1024  }
 0x25c   :  { %650 = vsyncadd [#allocation4], 4294966272 }
 0x25d   :  { %431 = vsyncpa [#allocation3], 1 }
 0x25e   :  { %432 = vsyncpa [#allocation6], 1 }
 0x25f   :  { %433 = vsyncpa [#allocation4], 1 }

</bundles_post_ra>
